<compile_context>
chip_gen: v5e
topology: v5e:2x2
jax: 0.10.0
libtpu: 0.0.40
codegen_flags: <defaults>
</compile_context>

<pallas_src>
import functools

import jax
import jax.numpy as jnp
from jax.experimental import pallas as pl
from jax.experimental.pallas import tpu as pltpu


def _slr_kernel(*refs, has_bias):
    if has_bias:
        x_ref, w_ref, b_ref, r_ref, o_ref, acc_ref, wss_ref = refs
    else:
        x_ref, w_ref, o_ref, acc_ref, wss_ref = refs

    k = pl.program_id(2)

    @pl.when(k == 0)
    def _init():
        acc_ref[...] = jnp.zeros_like(acc_ref)
        wss_ref[...] = jnp.zeros_like(wss_ref)

    x = x_ref[...]                      # (tm, tk), input dtype
    w = w_ref[...]                      # (tn, tk), input dtype

    # cosine partial: contract on K for both operands (native MXU feed, no .T),
    # accumulate in f32.
    acc_ref[...] += jax.lax.dot_general(
        x, w,
        dimension_numbers=(((1,), (1,)), ((), ())),
        preferred_element_type=jnp.float32)          # (tm, tn)

    # Per-row sum-of-squares of the weight, accumulated over k as a lane-dense
    # (1, tn) vector: ones(1, tk) . (w*w)(tn, tk) contracting on K.
    wf = w.astype(jnp.float32)
    wsq = wf * wf                                    # (tn, tk) f32
    ones_row = jnp.ones((1, wsq.shape[1]), jnp.float32)
    wss_ref[...] += jax.lax.dot_general(
        ones_row, wsq,
        dimension_numbers=(((1,), (1,)), ((), ())),
        preferred_element_type=jnp.float32)          # (1, tn)

    @pl.when(k == pl.num_programs(2) - 1)
    def _epilogue():
        # 1 / max(||w_row||, 1e-12) == rsqrt(max(||w_row||^2, 1e-24))
        inv_norm = jax.lax.rsqrt(jnp.maximum(wss_ref[...], 1e-24))   # (1, tn)
        out = acc_ref[...] * inv_norm                                # (tm, tn)
        if has_bias:
            r = r_ref[0, 0]                                          # f32 scalar (SMEM)
            out = out + r * jnp.tanh(b_ref[...].astype(jnp.float32))
        o_ref[...] = out.astype(o_ref.dtype)


def _round_up(v, m):
    return ((v + m - 1) // m) * m


def slr_layer(x, weight, bias=None, bias_bool=True,
              tm=256, tn=256, tk=512,
              vmem_limit_bytes=32 * 1024 * 1024):
    """Pallas TPU forward pass of SLR_layer.

    x: (N, K), weight: (F, K) (PyTorch Linear layout), bias: (F,) or None.
    """
    N, K = x.shape
    F_out, K2 = weight.shape
    assert K == K2, "in_features mismatch"

    # Clamp tiles to the (padded) problem, keep (8, 128)-friendly shapes.
    tm = min(tm, _round_up(N, 8))
    tn = min(tn, _round_up(F_out, 128))
    tk = min(tk, _round_up(K, 128))

    Np = _round_up(N, tm)
    Fp = _round_up(F_out, tn)
    Kp = _round_up(K, tk)

    xp = x if (Np == N and Kp == K) else jnp.pad(x, ((0, Np - N), (0, Kp - K)))
    wp = weight if (Fp == F_out and Kp == K) else jnp.pad(
        weight, ((0, Fp - F_out), (0, Kp - K)))

    grid = (Np // tm, Fp // tn, Kp // tk)

    in_specs = [
        pl.BlockSpec((tm, tk), lambda i, j, k: (i, k)),   # x
        pl.BlockSpec((tn, tk), lambda i, j, k: (j, k)),   # weight
    ]
    inputs = [xp, wp]

    has_bias = bool(bias_bool) and bias is not None
    if has_bias:
        bp = bias.astype(jnp.float32).reshape(1, F_out)
        if Fp != F_out:
            bp = jnp.pad(bp, ((0, 0), (0, Fp - F_out)))
        # r = ||x[0, :]||_2, computed once on the *global* row 0 (hoisted out
        # of the kernel so it stays correct under N-tiling / megacore).
        r = jnp.sqrt(jnp.sum(x[0, :].astype(jnp.float32) ** 2)).reshape(1, 1)
        in_specs += [
            pl.BlockSpec((1, tn), lambda i, j, k: (0, j)),            # bias
            pl.BlockSpec(memory_space=pltpu.MemorySpace.SMEM),        # r scalar
        ]
        inputs += [bp, r]

    kernel = functools.partial(_slr_kernel, has_bias=has_bias)

    out = pl.pallas_call(
        kernel,
        out_shape=jax.ShapeDtypeStruct((Np, Fp), x.dtype),
        grid_spec=pltpu.PrefetchScalarGridSpec(
            num_scalar_prefetch=0,
            grid=grid,
            in_specs=in_specs,
            out_specs=pl.BlockSpec((tm, tn), lambda i, j, k: (i, j)),
            scratch_shapes=[
                pltpu.VMEM((tm, tn), jnp.float32),   # matmul accumulator
                pltpu.VMEM((1, tn), jnp.float32),    # weight-row sum-of-squares
            ],
        ),
        compiler_params=pltpu.CompilerParams(
            dimension_semantics=("parallel", "parallel", "arbitrary"),
            vmem_limit_bytes=vmem_limit_bytes,
        ),
    )(*inputs)

    return out[:N, :F_out]


def slr_reference(x, weight, bias=None):
    w_n = weight / jnp.maximum(
        jnp.linalg.norm(weight, axis=1, keepdims=True), 1e-12)
    out = x @ w_n.T
    if bias is not None:
        r = jnp.linalg.norm(x[0, :])
        out = out + r * jnp.tanh(bias)[None, :]
    return out


if __name__ == "__main__":
    key = jax.random.PRNGKey(0)
    k_x, k_w, k_b = jax.random.split(key, 3)

    N, in_features, out_features = 16, 256, 256

    x = jax.random.normal(k_x, (N, in_features), dtype=jnp.float32)

    # xavier_uniform_ init for weight (deterministic via PRNGKey)
    bound = (6.0 / (in_features + out_features)) ** 0.5
    weight = jax.random.uniform(
        k_w, (out_features, in_features), minval=-bound, maxval=bound,
        dtype=jnp.float32)
    # Module inits bias to zeros; use small non-zero values so r*tanh(bias) is
    # actually exercised.
    bias = 0.1 * jax.random.normal(k_b, (out_features,), dtype=jnp.float32)

    # Small tiles so the multi-block (i, j, k) accumulation + epilogue path is
    # exercised (grid = (2, 2, 2)). Production sizes use the larger defaults.
    out = slr_layer(x, weight, bias, bias_bool=True, tm=8, tn=128, tk=128)
    out = jax.block_until_ready(out)
    ref = slr_reference(x, weight, bias)
    assert out.shape == (N, out_features)
    assert jnp.allclose(out, ref, rtol=1e-5, atol=1e-4), "mismatch vs reference (bias)"

    out_nb = slr_layer(x, weight, bias=None, bias_bool=False, tm=8, tn=128, tk=128)
    out_nb = jax.block_until_ready(out_nb)
    ref_nb = slr_reference(x, weight, None)
    assert jnp.allclose(out_nb, ref_nb, rtol=1e-5, atol=1e-4), "mismatch vs reference (no bias)"

    print("KERNEL_OK")
</pallas_src>

<mosaic_0001>
module attributes {stable_mosaic.version = 11 : i64} {
  func.func @_slr_kernel(%arg0: i32, %arg1: i32, %arg2: i32, %arg3: memref<8x128xf32, #tpu.memory_space<vmem>>, %arg4: memref<128x128xf32, #tpu.memory_space<vmem>>, %arg5: memref<1x128xf32, #tpu.memory_space<vmem>>, %arg6: memref<1x1xf32, #tpu.memory_space<smem>>, %arg7: memref<8x128xf32, #tpu.memory_space<vmem>>, %arg8: memref<8x128xf32, #tpu.memory_space<vmem>>, %arg9: memref<1x128xf32, #tpu.memory_space<vmem>>) attributes {dimension_semantics = [#tpu.dimension_semantics<parallel>, #tpu.dimension_semantics<parallel>, #tpu.dimension_semantics<arbitrary>], iteration_bounds = array<i64: 2, 2, 2>, scalar_prefetch = 0 : i64, scratch_operands = 2 : i64, tpu.core_type = #tpu.core_type<tc>, window_params = [{transform_indices = @transform_0, window_bounds = array<i64: 8, 128>}, {transform_indices = @transform_1, window_bounds = array<i64: 128, 128>}, {transform_indices = @transform_2, window_bounds = array<i64: 1, 128>}, {transform_indices = @transform_3, window_bounds = array<i64: 1, 1>}, {transform_indices = @transform_4, window_bounds = array<i64: 8, 128>}]} {
    %c0_i32 = arith.constant 0 : i32
    %0 = arith.cmpi eq, %arg2, %c0_i32 : i32
    %1 = arith.extui %0 : i1 to i32
    %c0_i32_0 = arith.constant 0 : i32
    %2 = arith.cmpi ne, %1, %c0_i32_0 : i32
    scf.if %2 {
      %cst_15 = arith.constant 0.000000e+00 : f32
      %18 = vector.broadcast %cst_15 : f32 to vector<8x128xf32>
      %c0_16 = arith.constant 0 : index
      %c0_17 = arith.constant 0 : index
      %19 = vector.load %arg8[%c0_16, %c0_17] : memref<8x128xf32, #tpu.memory_space<vmem>>, vector<8x128xf32>
      tpu.vector_store %arg8[%c0_16, %c0_17], %18 {strides = array<i32>} : memref<8x128xf32, #tpu.memory_space<vmem>>, vector<8x128xf32>,
      %cst_18 = arith.constant 0.000000e+00 : f32
      %20 = vector.broadcast %cst_18 : f32 to vector<1x128xf32>
      %c0_19 = arith.constant 0 : index
      %c0_20 = arith.constant 0 : index
      %21 = vector.load %arg9[%c0_19, %c0_20] : memref<1x128xf32, #tpu.memory_space<vmem>>, vector<1x128xf32>
      tpu.vector_store %arg9[%c0_19, %c0_20], %20 {strides = array<i32>} : memref<1x128xf32, #tpu.memory_space<vmem>>, vector<1x128xf32>,
    } else {
    }
    %c0 = arith.constant 0 : index
    %c0_1 = arith.constant 0 : index
    %3 = vector.load %arg3[%c0, %c0_1] : memref<8x128xf32, #tpu.memory_space<vmem>>, vector<8x128xf32>
    %c0_2 = arith.constant 0 : index
    %c0_3 = arith.constant 0 : index
    %4 = vector.load %arg4[%c0_2, %c0_3] : memref<128x128xf32, #tpu.memory_space<vmem>>, vector<128x128xf32>
    %c0_4 = arith.constant 0 : index
    %c0_5 = arith.constant 0 : index
    %5 = vector.load %arg8[%c0_4, %c0_5] : memref<8x128xf32, #tpu.memory_space<vmem>>, vector<8x128xf32>
    %cst = arith.constant dense<0.000000e+00> : vector<8x128xf32>
    %6 = tpu.matmul %3, %4, %cst {dimension_numbers = #tpu.dot_dimension_numbers<[1], [1], [0], [0], [0, 0, 1, 0], [], []>} : vector<8x128xf32>, vector<128x128xf32>, vector<8x128xf32> -> vector<8x128xf32>
    %7 = arith.addf %5, %6 : vector<8x128xf32>
    %c0_6 = arith.constant 0 : index
    %c0_7 = arith.constant 0 : index
    %8 = vector.load %arg8[%c0_6, %c0_7] : memref<8x128xf32, #tpu.memory_space<vmem>>, vector<8x128xf32>
    tpu.vector_store %arg8[%c0_6, %c0_7], %7 {strides = array<i32>} : memref<8x128xf32, #tpu.memory_space<vmem>>, vector<8x128xf32>,
    %9 = arith.mulf %4, %4 : vector<128x128xf32>
    %cst_8 = arith.constant 1.000000e+00 : f32
    %10 = vector.broadcast %cst_8 : f32 to vector<1x128xf32>
    %c0_9 = arith.constant 0 : index
    %c0_10 = arith.constant 0 : index
    %11 = vector.load %arg9[%c0_9, %c0_10] : memref<1x128xf32, #tpu.memory_space<vmem>>, vector<1x128xf32>
    %cst_11 = arith.constant dense<0.000000e+00> : vector<1x128xf32>
    %12 = tpu.matmul %10, %9, %cst_11 {dimension_numbers = #tpu.dot_dimension_numbers<[1], [1], [0], [0], [0, 0, 1, 0], [], []>} : vector<1x128xf32>, vector<128x128xf32>, vector<1x128xf32> -> vector<1x128xf32>
    %13 = arith.addf %11, %12 : vector<1x128xf32>
    %c0_12 = arith.constant 0 : index
    %c0_13 = arith.constant 0 : index
    %14 = vector.load %arg9[%c0_12, %c0_13] : memref<1x128xf32, #tpu.memory_space<vmem>>, vector<1x128xf32>
    tpu.vector_store %arg9[%c0_12, %c0_13], %13 {strides = array<i32>} : memref<1x128xf32, #tpu.memory_space<vmem>>, vector<1x128xf32>,
    %c1_i32 = arith.constant 1 : i32
    %15 = arith.cmpi eq, %arg2, %c1_i32 : i32
    %16 = arith.extui %15 : i1 to i32
    %c0_i32_14 = arith.constant 0 : i32
    %17 = arith.cmpi ne, %16, %c0_i32_14 : i32
    scf.if %17 {
      %c0_15 = arith.constant 0 : index
      %c0_16 = arith.constant 0 : index
      %18 = vector.load %arg9[%c0_15, %c0_16] : memref<1x128xf32, #tpu.memory_space<vmem>>, vector<1x128xf32>
      %cst_17 = arith.constant 1.000000e-24 : f32
      %19 = vector.broadcast %cst_17 : f32 to vector<1x128xf32>
      %20 = arith.maximumf %18, %19 : vector<1x128xf32>
      %21 = math.rsqrt %20 : vector<1x128xf32>
      %c0_18 = arith.constant 0 : index
      %c0_19 = arith.constant 0 : index
      %22 = vector.load %arg8[%c0_18, %c0_19] : memref<8x128xf32, #tpu.memory_space<vmem>>, vector<8x128xf32>
      %23 = vector.broadcast %21 : vector<1x128xf32> to vector<8x128xf32>
      %24 = arith.mulf %22, %23 : vector<8x128xf32>
      %c0_20 = arith.constant 0 : index
      %c0_21 = arith.constant 0 : index
      %25 = memref.load %arg6[%c0_20, %c0_21] : memref<1x1xf32, #tpu.memory_space<smem>>
      %c0_22 = arith.constant 0 : index
      %c0_23 = arith.constant 0 : index
      %26 = vector.load %arg5[%c0_22, %c0_23] : memref<1x128xf32, #tpu.memory_space<vmem>>, vector<1x128xf32>
      %27 = math.tanh %26 : vector<1x128xf32>
      %28 = vector.broadcast %25 : f32 to vector<1x128xf32>
      %29 = arith.mulf %28, %27 : vector<1x128xf32>
      %30 = vector.broadcast %29 : vector<1x128xf32> to vector<8x128xf32>
      %31 = arith.addf %24, %30 : vector<8x128xf32>
      %c0_24 = arith.constant 0 : index
      %c0_25 = arith.constant 0 : index
      %32 = vector.load %arg7[%c0_24, %c0_25] : memref<8x128xf32, #tpu.memory_space<vmem>>, vector<8x128xf32>
      tpu.vector_store %arg7[%c0_24, %c0_25], %31 {strides = array<i32>} : memref<8x128xf32, #tpu.memory_space<vmem>>, vector<8x128xf32>,
    } else {
    }
    return
  }
  func.func @transform_0(%arg0: i32, %arg1: i32, %arg2: i32) -> (i32, i32) {
    %c0_i32 = arith.constant 0 : i32
    return %arg0, %arg2 : i32, i32
  }
  func.func @transform_1(%arg0: i32, %arg1: i32, %arg2: i32) -> (i32, i32) {
    %c0_i32 = arith.constant 0 : i32
    return %arg1, %arg2 : i32, i32
  }
  func.func @transform_2(%arg0: i32, %arg1: i32, %arg2: i32) -> (i32, i32) {
    %c0_i32 = arith.constant 0 : i32
    %c0_i32_0 = arith.constant 0 : i32
    return %c0_i32, %arg1 : i32, i32
  }
  func.func @transform_3(%arg0: i32, %arg1: i32, %arg2: i32) -> (i32, i32) {
    %c0_i32 = arith.constant 0 : i32
    %c0_i32_0 = arith.constant 0 : i32
    %c0_i32_1 = arith.constant 0 : i32
    return %c0_i32, %c0_i32_0 : i32, i32
  }
  func.func @transform_4(%arg0: i32, %arg1: i32, %arg2: i32) -> (i32, i32) {
    %c0_i32 = arith.constant 0 : i32
    return %arg0, %arg1 : i32, i32
  }
}

</mosaic_0001>

<bundles_post_ra>
// kernel: tpu_custom_call.1
= control target key start
LH: loop header
LB: loop body
LE: loop exit
PB: predicated region body
PF: predicated region fallthrough
CT: control target
= control target key end

     0   :  { %s1332_s0 = inlined_call_operand.hbm [shape: f32[16,256], index: 0, kind: input, shape index: {}]   ;;  %s1333_s1 = inlined_call_operand.hbm [shape: f32[256,256], index: 1, kind: input, shape index: {}]   ;;  %s1334_s2 = inlined_call_operand.vmem [shape: f32[1,256], index: 2, kind: input, shape index: {}]   ;;  %s1335_s3 = inlined_call_operand.<no memory space> [shape: f32[1,1], index: 3, kind: input, shape index: {}]   ;;  %s1336_s4 = inlined_call_operand.hbm [shape: f32[16,256], index: 4, kind: output, shape index: {}]  }
   0x1   :  { %1348 = sst [smem:[#allocation26_spill]] %s1332_s0 }
   0x2   :  { %1349 = sst [smem:[#allocation27_spill]] %s1336_s4 }
   0x3   :  { %9 = sst [smem:[#allocation4]] %s1335_s3 }
   0x4   :  { %10 = vsyncpa [#allocation6], 0 }
   0x5   :  { %12 = vsyncpa [#allocation6 + $0x1], 0 }
   0x6   :  { %13 = vsyncpa [#allocation9], 0 }
   0x7   :  { %15 = vsyncpa [#allocation9 + $0x1], 0 }
   0x8   :  { %16 = vsyncpa [#allocation7], 0 }
   0x9   :  { %18 = vsyncpa [#allocation7 + $0x1], 0  ;;  %s1001_s17 = smov 0   ;;  %s1003_s18 = smov 0  }
   0xa   :  { %s1005_s19 = smov 0   ;;  %s1007_s20 = smov 0  }
   0xb   :  { %s1009_s21 = smov 0   ;;  %s1011_s22 = smov 0  }
   0xc   :  { %s1013_s23 = smov 0   ;;  %s1015_s3 = smov 0  }
   0xd   :  { %s1017_s24 = smov 0   ;;  %s1019_s25 = smov 0  }
   0xe   :  { %s1021_s26 = smov 0   ;;  %s1023_s27 = smov 0  }
   0xf   :  { %s1025_s28 = smov 0   ;;  %s1027_s29 = smov 0  }
  0x10   :  { %s1029_s30 = smov 0   ;;  %s1031_s5 = smov 0  }
  0x11 LB: > { %1350 = sst [smem:[#allocation14_spill]] %s906_s17  ;;  %s1337_s6 = sadd.s32 4294967295, %s966_s5   ;;  %s966_s5 = sphi %s1031_s5, %s24_s5   ;;  %s962_s30 = sphi %s1029_s30, %s1400_s30   ;;  %s958_s29 = sphi %s1027_s29, %s1399_s29   ;;  %s954_s28 = sphi %s1025_s28, %s1398_s28   ;;  %s950_s27 = sphi %s1023_s27, %s1397_s27   ;;  %s946_s26 = sphi %s1021_s26, %s1396_s26   ;;  %s942_s25 = sphi %s1019_s25, %s1395_s25   ;;  %s938_s24 = sphi %s1017_s24, %s1384_s24   ;;  %s934_s3 = sphi %s1015_s3, %s1394_s3   ;;  %s930_s23 = sphi %s1013_s23, %s1393_s23   ;;  %s926_s22 = sphi %s1011_s22, %s1392_s22   ;;  %s922_s21 = sphi %s1009_s21, %s1391_s21   ;;  %s918_s20 = sphi %s1007_s20, %s1390_s20   ;;  %s914_s19 = sphi %s1005_s19, %s1381_s19   ;;  %s910_s18 = sphi %s1003_s18, %s1389_s18   ;;  %s906_s17 = sphi %s1001_s17, %s1388_s17  }
  0x12   : > { %1351 = sst [smem:[#allocation15_spill]] %s914_s19  ;;  %s36_s8 = sadd.s32 1, %s954_s28 }
  0x13   : > { %1352 = sst [smem:[#allocation16_spill]] %s938_s24  ;;  %s39_s9 = sadd.s32 1, %s958_s29 }
  0x14   : > { %1353 = sst [smem:[#allocation17_spill]] %s950_s27  ;;  %p37_p0 = scmp.ge.s32.totalorder %s36_s8, 2 }
  0x15   : > { %s43_s10 = sadd.s32 1, %s962_s30  ;;  %s52_s11 = sadd.s32 1, %s938_s24 }
  0x16   : > { %p59_p1 = scmp.ne.s32.totalorder %s938_s24, %s934_s3  ;;  %s1402_s8 = smov (%p37_p0, %s36_s8), 0 }
  0x17   : > { %1354 = sst [smem:[#allocation18_spill]] %s1402_s8  ;;  %s1404_s9 = smov (!%p37_p0, %s39_s9), %s958_s29 }
  0x18   : > { %s48_s12 = ssub.s32 %s954_s28, %s1402_s8  ;;  %p60_p2 = scmp.eq.s32.totalorder %s966_s5, 0 }
  0x19   : > { %p41_p3 = scmp.ge.s32.totalorder %s1404_s9, 2  ;;  %p65_p4 = scmp.ne.s32.totalorder %s934_s3, %s930_s23 }
  0x1a   : > { %p1096_p5 = por %p60_p2, %p59_p1  ;;  %p1102_p6 = scmp.eq.s32.totalorder %s1337_s6, 0 }
  0x1b   : > { %s1406_s9 = smov (%p41_p3, %s1404_s9), 0  ;;  %s1408_s10 = smov (!%p41_p3, %s43_s10), %s962_s30 }
  0x1c   : > { %1357 = sst [smem:[#allocation19_spill]] %s1406_s9  ;;  %p1111_p7 = por %p1102_p6, %p65_p4 }
  0x1d   : > { %s75_s16 = ssub.s32 %s958_s29, %s1406_s9  ;;  %p45_p8 = scmp.ge.s32.totalorder %s1408_s10, 2 }
  0x1e   : > { %s77_s23 = sor.u32 %s75_s16, %s48_s12  ;;  %s80_s7 = sadd.s32 1, %s926_s22 }
  0x1f   : > { %p78_p9 = scmp.eq.s32.totalorder %s77_s23, 0  ;;  %s1410_s10 = smov (%p45_p8, %s1408_s10), 0 }
  0x20   : > { %1359 = sst [smem:[#allocation20_spill]] %s1410_s10  ;;  %s47_s8 = ssub.s32 %s962_s30, %s1410_s10 }
  0x21   : > { %s1121_s6 = scalar_select %p78_p9, %s926_s22, %s80_s7  }
  0x22   : > { %p87_p10 = scmp.ne.s32.totalorder %s926_s22, %s922_s21  ;;  %s49_s9 = sor.u32 %s48_s12, %s47_s8 }
  0x23   : > { %1360 = sst [smem:[#allocation21_spill]] %s1121_s6  ;;  %p93_p11 = scmp.ne.s32.totalorder %s922_s21, %s918_s20 }
  0x24   : > { %p50_p12 = scmp.eq.s32.totalorder %s49_s9, 0  ;;  %p1131_p13 = por %p87_p10, %p60_p2 }
  0x25   : > { %p1137_p0 = por %p93_p11, %p1102_p6  ;;  %s152_s10 = sor.u32 %s75_s16, %s47_s8 }
  0x26   : > { %s1142_s6 = scalar_select %p50_p12, %s938_s24, %s52_s11  }
  0x27   : > { %p153_p1 = scmp.eq.s32.totalorder %s152_s10, 0  ;;  %s155_s12 = sadd.s32 1, %s914_s19 }
  0x28   : > { %1363 = sst [smem:[#allocation22_spill]] %s1142_s6  ;;  %p165_p3 = scmp.ne.s32.totalorder %s914_s19, %s910_s18 }
  0x29   : > { %s1364_s20 = sadd.s32 4294967295, %s966_s5   ;;  %p171_p6 = scmp.ne.s32.totalorder %s910_s18, %s906_s17 }
  0x2a   : > { %p166_p4 = scmp.eq.s32.totalorder %s1364_s20, 7  ;;  %s1368_s4 = sadd.s32 4294967294, %s966_s5  }
  0x2b   : > { %s1150_s9 = scalar_select %p153_p1, %s914_s19, %s155_s12  }
  0x2c   : > { %p1152_p2 = por %p166_p4, %p165_p3  ;;  %p172_p8 = scmp.eq.s32.totalorder %s1368_s4, 7 }
  0x2d   : > { %1365 = sst [smem:[#allocation23_spill]] %s1150_s9  ;;  %p601_p9 = scmp.lt.s32.totalorder %s966_s5, 8 }
  0x2e   : > { %s1366_s14 = scalar_select %p1152_p2, 1, 0 }
  0x2f   : > { %s195_s8 = sand.u32 1, %s938_s24   ;;  %p1162_p10 = por %p172_p8, %p171_p6 }
  0x30   : > { %1367 = sst [smem:[#allocation24_spill]] %s1366_s14  ;;  %s565_s11 = sshll.u32 %s195_s8, 3 }
  0x31   : > { %s1369_s10 = scalar_select %p1162_p10, 1, 0 }
  0x32   : > { %s566_s16 = sshll.u32 %s962_s30, 1  ;;  %s199_s6 = scalar_lea.vmem [#allocation5], %s565_s11 }
  0x33   : > { %1370 = sst [smem:[#allocation25_spill]] %s1369_s10  ;;  %s203_s12 = sadd.s32 %s954_s28, %s566_s16 }
  0x34   : > { %s567_s20 = sshll.u32 %s203_s12, 3  ;;  %s209_s9 = sshll.u32 %s199_s6, 4  ;;  %s210_s9 = int_to_ptr.vmem [resolvable:$true] %s209_s9 }
  0x35   : > { %s1371_s0 = sld [smem:[#allocation26_spill]]  ;;  %p591_p11 = pnand %p601_p9, %p1096_p5 }
  0x36   : > { %s583_s10 = sshll.u32 %s958_s29, 5  ;;  %s196_s27 = scalar_lea.sflag [#allocation6], %s195_s8 }
  0x37   : > { %s225_s14 = sadd.s32 %s954_s28, %s583_s10  ;;  %p1181_p12 = pnand %p601_p9, %p1131_p13 }
  0x38   : > { %p572_p1 = scmp.ge.s32.totalorder %s966_s5, 1  ;;  %p244_p3 = scmp.lt.s32.totalorder %s966_s5, 9 }
  0x39   : > { %s216_s19 = sand.u32 1, %s926_s22   ;;  %s571_s13 = sshll.u32 %s225_s14, 3 }
  0x3a   : > { %p1188_p4 = pnand %p572_p1, %p244_p3  ;;  %s568_s6 = sshll.u32 %s216_s19, 7 }
  0x3b   : > { %s205_s17 = scalar_lea.hbm %s1371_s0, %s567_s20  ;;  %s217_s8 = scalar_lea.sflag [#allocation9], %s216_s19 }
  0x3c   : > { %s207_s24 = sshll.u32 %s205_s17, 4  ;;  %s968_s12 = smov 256   ;;  %s208_s24 = int_to_ptr.hbm [resolvable:$true] %s207_s24 }
  0x3d   : > { %593 = dma.hbm_to_vmem [thread:$0]  (!%p591_p11), %s208_s24, 128, %s210_s9, %s196_s27  }
  0x3e   : > { %s227_s24 = scalar_lea.hbm %s1333_s1, %s571_s13  ;;  %s220_s27 = scalar_lea.vmem [#allocation8], %s568_s6 }
  0x3f   : > { %s230_s23 = sshll.u32 %s220_s27, 4  ;;  %s228_s9 = sshll.u32 %s227_s24, 4  ;;  %s231_s23 = int_to_ptr.vmem [resolvable:$true] %s230_s23  ;;  %s229_s9 = int_to_ptr.hbm [resolvable:$true] %s228_s9 }
  0x40   : > { %s969_s20 = smov 128   ;;  %s970_s4 = smov 8  }
  0x41   : > { %596 = dma.hbm_to_vmem [thread:$0]  (!%p1181_p12), %s229_s9, 2048, %s231_s23, %s217_s8, %s968_s12, %s969_s20, %s970_s4  }
  0x42   : > { %248 = sbr.rel (%p1188_p4) target bundleno = 339 (0x153), region = 36  ;;  %s250_s14 = sand.u32 (!%p1188_p4), 1, %s934_s3  }
  0x43   : > { %s1200_s0 = sshll.u32 (!%p1188_p4), %s250_s14, 3  ;;  %s251_s6 = scalar_lea.sflag (!%p1188_p4), [#allocation6], %s250_s14 }
  0x44   : > { %s254_s13 = scalar_lea.vmem (!%p1188_p4), [#allocation5], %s1200_s0 }
  0x47   : > { %893 = dma.done.wait (%p1111_p7), %s251_s6, 128  }
  0x48   : > { %895 = vsyncadd (%p1111_p7), %s251_s6, 4294967168  ;;  %s260_s16 = sand.u32 1, %s922_s21  }
  0x49   : > { %s574_s19 = sshll.u32 %s260_s16, 7  ;;  %s261_s11 = scalar_lea.sflag [#allocation9], %s260_s16 }
  0x4a   : > { %s1208_s17 = scalar_lea.vmem [#allocation8], %s574_s19 }
  0x4b   : > { %897 = dma.done.wait (%p1137_p0), %s261_s11, 2048  }
  0x4c   : > { %899 = vsyncadd (%p1137_p0), %s261_s11, 4294965248  ;;  %s295_s10 = sand.u32 1, %s910_s18   ;;  %p299_p5 = scmp.lt.s32.totalorder %s946_s26, 1 }
  0x4d   : > { %s1218_s15 = sshll.u32 %s295_s10, 3  ;;  %p576_p7 = scmp.ne.s32.totalorder %s942_s25, 0 }
  0x4e   : > { %s1221_s24 = scalar_select %p299_p5, %s946_s26, 1 }
  0x4f   : > { %s297_s8 = scalar_lea.vmem [#allocation10], %s1218_s15  ;;  %305 = sbr.rel (%p576_p7) target bundleno = 87 (0x57), region = 48 }
  0x50   : > { %s301_s9 = scalar_lea.vmem %s1334_s2, %s1221_s24 }
  0x54   : > { %v971_v0 = vmov 0.0  }
  0x55   : > { %306 = vst [vmem:[#allocation2] sm:$0xff] %v971_v0 }
  0x56   : > { %307 = vst [vmem:[#allocation3] sm:$0x1] %v971_v0 }
  0x57 PF: > { %v324_v1 = vld [vmem:[%s1208_s17 + $0x78] sm:$0xff]  ;;  %v323_v2 = vld [vmem:[%s1208_s17 + $0x70] sm:$0xff]  ;;  %v322_v5 = vld [vmem:[%s1208_s17 + $0x68] sm:$0xff]  ;;  %v972_v34 = vmov 1.0   ;;  %p577_p13 = scmp.ne.s32.totalorder %s942_s25, 1 }
  0x58   : > { %326 = vmatpush.xpose.msra.mxu0 %v324_v1  ;;  %v363_v3 = vmul.f32 %v324_v1, %v324_v1  ;;  %v362_v4 = vmul.f32 %v323_v2, %v323_v2  ;;  %v361_v6 = vmul.f32 %v322_v5, %v322_v5  ;;  %v321_v7 = vld [vmem:[%s1208_s17 + $0x60] sm:$0xff]  ;;  %v320_v9 = vld [vmem:[%s1208_s17 + $0x58] sm:$0xff]  ;;  %v319_v11 = vld [vmem:[%s1208_s17 + $0x50] sm:$0xff]  ;;  %s408_s12 = sld [smem:[#allocation4]] (!%p577_p13) }
  0x59   : > { %v360_v8 = vmul.f32 %v321_v7, %v321_v7  ;;  %v359_v10 = vmul.f32 %v320_v9, %v320_v9  ;;  %v358_v12 = vmul.f32 %v319_v11, %v319_v11  ;;  %v318_v13 = vld [vmem:[%s1208_s17 + $0x48] sm:$0xff]  ;;  %v317_v15 = vld [vmem:[%s1208_s17 + $0x40] sm:$0xff]  ;;  %v316_v17 = vld [vmem:[%s1208_s17 + $0x38] sm:$0xff] }
  0x5a   : > { %365 = vmatpush.xpose.msra.mxu1 %v363_v3  ;;  %v357_v14 = vmul.f32 %v318_v13, %v318_v13  ;;  %v356_v16 = vmul.f32 %v317_v15, %v317_v15  ;;  %v355_v18 = vmul.f32 %v316_v17, %v316_v17  ;;  %v315_v19 = vld [vmem:[%s1208_s17 + $0x30] sm:$0xff]  ;;  %v314_v21 = vld [vmem:[%s1208_s17 + $0x28] sm:$0xff]  ;;  %v313_v23 = vld [vmem:[%s1208_s17 + $0x20] sm:$0xff] }
  0x5b   : > { %v354_v20 = vmul.f32 %v315_v19, %v315_v19  ;;  %v353_v22 = vmul.f32 %v314_v21, %v314_v21  ;;  %v352_v24 = vmul.f32 %v313_v23, %v313_v23  ;;  %v312_v25 = vld [vmem:[%s1208_s17 + $0x18] sm:$0xff]  ;;  %v311_v27 = vld [vmem:[%s1208_s17 + $0x10] sm:$0xff]  ;;  %v310_v29 = vld [vmem:[%s1208_s17 + $0x8] sm:$0xff] }
  0x5c   : > { %327 = vmatpush.xpose.msra.mxu0 %v323_v2  ;;  %v351_v26 = vmul.f32 %v312_v25, %v312_v25  ;;  %v350_v28 = vmul.f32 %v311_v27, %v311_v27  ;;  %v349_v30 = vmul.f32 %v310_v29, %v310_v29  ;;  %v309_v31 = vld [vmem:[%s1208_s17] sm:$0xff]  ;;  %v308_v33 = vld [vmem:[%s254_s13] sm:$0xff] }
  0x5d   : > { %v348_v32 = vmul.f32 %v309_v31, %v309_v31  ;;  %v325_v35 = vld [vmem:[#allocation2] sm:$0xff]  ;;  %v364_v37 = vld [vmem:[#allocation3] sm:$0x1] }
  0x5e   : > { %366 = vmatpush.xpose.msra.mxu1 %v362_v4 }
  0x60   : > { %328 = vmatpush.xpose.msra.mxu0 %v322_v5 }
  0x62   : > { %367 = vmatpush.xpose.msra.mxu1 %v361_v6 }
  0x64   : > { %329 = vmatpush.xpose.msra.mxu0 %v321_v7 }
  0x66   : > { %368 = vmatpush.xpose.msra.mxu1 %v360_v8 }
  0x68   : > { %330 = vmatpush.xpose.msra.mxu0 %v320_v9 }
  0x6a   : > { %369 = vmatpush.xpose.msra.mxu1 %v359_v10 }
  0x6c   : > { %331 = vmatpush.xpose.msra.mxu0 %v319_v11 }
  0x6e   : > { %370 = vmatpush.xpose.msra.mxu1 %v358_v12 }
  0x70   : > { %332 = vmatpush.xpose.msra.mxu0 %v318_v13 }
  0x72   : > { %371 = vmatpush.xpose.msra.mxu1 %v357_v14 }
  0x74   : > { %333 = vmatpush.xpose.msra.mxu0 %v317_v15 }
  0x76   : > { %372 = vmatpush.xpose.msra.mxu1 %v356_v16 }
  0x78   : > { %334 = vmatpush.xpose.msra.mxu0 %v316_v17 }
  0x7a   : > { %373 = vmatpush.xpose.msra.mxu1 %v355_v18 }
  0x7c   : > { %335 = vmatpush.xpose.msra.mxu0 %v315_v19 }
  0x7e   : > { %374 = vmatpush.xpose.msra.mxu1 %v354_v20 }
  0x80   : > { %336 = vmatpush.xpose.msra.mxu0 %v314_v21 }
  0x82   : > { %375 = vmatpush.xpose.msra.mxu1 %v353_v22 }
  0x84   : > { %337 = vmatpush.xpose.msra.mxu0 %v313_v23 }
  0x86   : > { %376 = vmatpush.xpose.msra.mxu1 %v352_v24 }
  0x88   : > { %338 = vmatpush.xpose.msra.mxu0 %v312_v25 }
  0x8a   : > { %377 = vmatpush.xpose.msra.mxu1 %v351_v26 }
  0x8c   : > { %339 = vmatpush.xpose.msra.mxu0 %v311_v27 }
  0x8e   : > { %378 = vmatpush.xpose.msra.mxu1 %v350_v28 }
  0x90   : > { %340 = vmatpush.xpose.msra.mxu0 %v310_v29 }
  0x92   : > { %379 = vmatpush.xpose.msra.mxu1 %v349_v30 }
  0x94   : > { %341 = vmatpush.xpose.msra.mxu0 %v309_v31 }
  0x96   : > { %380 = vmatpush.xpose.msra.mxu1 %v348_v32 }
  0x97   : > { %342 = vmatmul.f32.vlgmr.msra.gmra.mxu0 %v308_v33 }
  0x99   : > { %381 = vmatmul.f32.vlgmr.msra.gmra.mxu1 %v972_v34 }
 0x114   : > { %v343_v36 = vpop.f32.mrf.mxu0 }
 0x115   : > { %v346_v38 = vadd.f32 %v343_v36, %v325_v35  ;;  %390 = sbr.rel (%p577_p13) target bundleno = 316 (0x13c), region = 52 }
 0x116   : > { %v382_v39 = vpop.f32.mrf.mxu1 }
 0x117   : > { %347 = vst [vmem:[#allocation2] sm:$0xff] %v346_v38  ;;  %v385_v40 = vadd.f32 %v382_v39, %v364_v37 }
 0x119   : > { %386 = vst [vmem:[#allocation3] sm:$0x1] %v385_v40 }
 0x11a   : > { %v409_v43 = vld [vmem:[%s301_s9] sm:$0x1]  ;;  %v411_v49 = vstv %s408_s12 }
 0x11e   : > { %v403_v54 = vld [vmem:[#allocation2] sm:$0xff] }
 0x120   : > { %v391_v41 = vld [vmem:[#allocation3] sm:$0x1] }
 0x121   : > { %v392_v42 = vmax.f32 %v391_v41, 1e-24 }
 0x123   : > { %736 = vrsqrt.f32 %v392_v42  ;;  %vm399_vm0 = vweird.f32 %v392_v42 }
 0x124   : > { %738 = vtanh.f32 %v409_v43 }
 0x129   : > { %v737_v44 = vpop.eup %736 }
 0x12a   : > { %v394_v45 = vmul.f32 %v737_v44, %v392_v42  ;;  %v739_v47 = vpop.eup %738  ;;  %vm400_vm1 = vweird.f32 %v737_v44 }
 0x12b   : > { %vm401_vm2 = vmor %vm399_vm0, %vm400_vm1  ;;  %v412_v51 = vmul.f32 %v739_v47, %v411_v49 }
 0x12c   : > { %v395_v46 = vmul.f32 %v737_v44, %v394_v45 }
 0x12d   : > { %v414_v56 = vperm.slane %v412_v51, 0 }
 0x12e   : > { %v396_v48 = vmul.f32 0.5, %v395_v46 }
 0x130   : > { %v397_v50 = vsub.f32 1.5, %v396_v48 }
 0x132   : > { %v398_v52 = vmul.f32 %v737_v44, %v397_v50 }
 0x134   : > { %v402_v53 = vsel %vm401_vm2, %v737_v44, %v398_v52 }
 0x135   : > { %v405_v55 = vperm.slane %v402_v53, 0 }
 0x137   : > { %v407_v57 = vmul.f32 %v405_v55, %v403_v54 }
 0x139   : > { %v416_v58 = vadd.f32 %v414_v56, %v407_v57 }
 0x13b   : > { %417 = vst [vmem:[%s297_s8] sm:$0xff] %v416_v58 }
 0x13c PF: > { %s1374_s25 = sld [smem:[#allocation17_spill]]  ;;  %s433_s6 = sshll.u32 %s297_s8, 4  ;;  %s434_s6 = int_to_ptr.vmem [resolvable:$true] %s433_s6 }
 0x13d   : > { %s1376_s11 = sld [smem:[#allocation27_spill]]  ;;  %s419_s27 = scalar_lea.sflag [#allocation7], %s295_s10 }
 0x142   : > { %s579_s4 = sshll.u32 %s1374_s25, 1 }
 0x143   : > { %s429_s14 = sadd.s32 %s946_s26, %s579_s4  ;;  %s820_s8 = scalar_lea.hbm %s1376_s11, 32 }
 0x144   : > { %s580_s13 = sshll.u32 %s429_s14, 3 }
 0x145   : > { %s431_s17 = scalar_lea.hbm %s1376_s11, %s580_s13 }
 0x146   : > { %s435_s24 = sshll.u32 %s431_s17, 4  ;;  %s436_s24 = int_to_ptr.hbm [resolvable:$true] %s435_s24 }
 0x147   : > { %s814_s23 = sshra.s32 %s436_s24, 4  ;;  %s815_s23 = int_to_ptr.hbm [resolvable:$true] %s814_s23 }
 0x148   : > { %s816_s9 = scalar_lea.hbm %s815_s23, 8  ;;  %p821_p9 = scmp.lt.s32.totalorder %s815_s23, %s1376_s11 }
 0x149   : > { %p817_p0 = scmp.ne.s32.totalorder %s815_s23, %s816_s9  ;;  %p822_p11 = scmp.lt.s32.totalorder %s820_s8, %s816_s9 }
 0x14b   : > { %p818_p6 = pnand %p817_p0, %p1152_p2  ;;  %p823_p12 = por %p822_p11, %p821_p9 }
 0x14d   : > { %p819_p8 = pneg %p818_p6 }
 0x14f   : > { %p824_p1 = pnand %p823_p12, %p819_p8 }
 0x151   : > { %827 = shalt.err (!%p824_p1)
}
 0x152   : > { %588 = dma.vmem_to_hbm [thread:$0]  (%p1152_p2), %s434_s6, 128, %s436_s24, %s419_s27  }
 0x153 PF: > { %s1377_s10 = sld [smem:[#allocation14_spill]]  ;;  %p602_p3 = scmp.ge.s32.totalorder %s966_s5, 2 }
 0x155   : > { %p598_p4 = pnand %p602_p3, %p1162_p10 }
 0x157   : > { %p599_p5 = pneg %p598_p4 }
 0x159   : > { %s447_s25 = sand.u32 1, %s1377_s10  }
 0x15a   : > { %s448_s4 = scalar_lea.sflag [#allocation7], %s447_s25 }
 0x15b   : > { %901 = dma.done.wait (%p599_p5), %s448_s4, 128  }
 0x15c   : > { %903 = vsyncadd (%p599_p5), %s448_s4, 4294967168  ;;  %s24_s5 = sadd.s32 1, %s966_s5   ;;  %s1380_s20 = sld [smem:[#allocation15_spill]] }
 0x15d   : > { %p1279_p7 = scmp.ge.s32.totalorder %s24_s5, 10   ;;  %s1381_s19 = sld [smem:[#allocation23_spill]] }
 0x15e   : > { %s1382_s6 = sld [smem:[#allocation21_spill]]  ;;  %s1388_s17 = smov %s910_s18 }
 0x15f   : > { %s1383_s13 = sld [smem:[#allocation16_spill]]  ;;  %s1393_s23 = smov %s934_s3 }
 0x160   : > { %s1384_s24 = sld [smem:[#allocation22_spill]]  ;;  %s1395_s25 = smov %s954_s28 }
 0x161   : > { %s1385_s16 = sld [smem:[#allocation18_spill]]  ;;  %s1396_s26 = smov %s958_s29 }
 0x162   : > { %s1386_s9 = sld [smem:[#allocation19_spill]]  ;;  %s1389_s18 = smov %s1380_s20 }
 0x163   : > { %s1387_s15 = sld [smem:[#allocation20_spill]]  ;;  %s1390_s20 = smov %s922_s21 }
 0x164   : > { %s1391_s21 = smov %s926_s22  ;;  %s1392_s22 = smov %s1382_s6 }
 0x165   : > { %s1394_s3 = smov %s1383_s13  ;;  %s1397_s27 = smov %s962_s30 }
 0x166   :  { %23 = sbr.rel (!%p1279_p7) target bundleno = 17 (0x11), region = 105 }
 0x167   : > { %s1398_s28 = smov %s1385_s16 }
 0x168   : > { %s1399_s29 = smov %s1386_s9 }
 0x169   : > { %s1400_s30 = smov %s1387_s15 }
 0x16b   :  { %454 = vsyncpa [#allocation6], 1 }
 0x16c   :  { %456 = vsyncpa [#allocation6 + $0x1], 1 }
 0x16d   :  { %457 = vsyncpa [#allocation9], 1 }
 0x16e   :  { %459 = vsyncpa [#allocation9 + $0x1], 1 }
 0x16f   :  { %460 = vsyncpa [#allocation7], 1 }
 0x170   :  { %462 = vsyncpa [#allocation7 + $0x1], 1 }

</bundles_post_ra>
